<compile_context>
chip_gen: v7x
topology: tpu7x:2x2x1
jax: 0.10.0
libtpu: 0.0.40
codegen_flags: <defaults>
</compile_context>

<pallas_src>
import functools

import jax
import jax.numpy as jnp
from jax import lax
from jax.experimental import pallas as pl
from jax.experimental.pallas import tpu as pltpu


def _sobel_kernel(mid_ref, up_ref, dn_ref, o_ref, *, img_h, img_w, tile_rows):
    t = pl.program_id(0)
    x = mid_ref[...].astype(jnp.float32)                      # (TH, Wp)
    th, wp = x.shape

    # Which rows of this tile are an image's top / bottom row (zero padding
    # above / below every image in the flattened (N*H) row space).
    r_iota = lax.broadcasted_iota(jnp.int32, (th, 1), 0)      # (TH, 1)
    row_in_img = (t * tile_rows + r_iota) % img_h
    is_top = row_in_img == 0
    is_bot = row_in_img == (img_h - 1)

    # Vertical +-1 row neighbours: in-tile rows via a sublane roll, the single
    # out-of-tile row from the prefetched 8-row halo blocks.
    halo_top = up_ref[7:8, :].astype(jnp.float32)             # row just above tile
    halo_bot = dn_ref[0:1, :].astype(jnp.float32)             # row just below tile
    x_up = jnp.roll(x, 1, axis=0)
    x_up = jnp.where(r_iota == 0, halo_top, x_up)
    x_up = jnp.where(is_top, 0.0, x_up)                       # zero pad above image
    x_dn = jnp.roll(x, -1, axis=0)
    x_dn = jnp.where(r_iota == th - 1, halo_bot, x_dn)
    x_dn = jnp.where(is_bot, 0.0, x_dn)                       # zero pad below image

    # Separable Sobel: vertical pass ...
    v1 = x_up + 2.0 * x + x_dn        # [1, 2, 1] column filter
    v2 = x_up - x_dn                  # [1, 0, -1] column filter

    # ... then +-1 column (lane) shifts, masking only the two boundary columns.
    c_iota = lax.broadcasted_iota(jnp.int32, (1, wp), 1)      # (1, Wp)
    not_first = c_iota != 0
    not_last = c_iota != (img_w - 1)

    v1_l = jnp.where(not_first, jnp.roll(v1, 1, axis=1), 0.0)   # v1[., j-1]
    v1_r = jnp.where(not_last, jnp.roll(v1, -1, axis=1), 0.0)   # v1[., j+1]
    v2_l = jnp.where(not_first, jnp.roll(v2, 1, axis=1), 0.0)
    v2_r = jnp.where(not_last, jnp.roll(v2, -1, axis=1), 0.0)

    sx = v1_r - v1_l
    sy = v2_l + 2.0 * v2 + v2_r
    o_ref[...] = (jnp.abs(sx) + jnp.abs(sy)).astype(o_ref.dtype)


def _pick_tile_rows(total_rows, padded_width, itemsize):
    """Row-tile size: ~1 MiB per input tile, a multiple of 8, and small enough
    that the grid has at least ~4 steps (pipelining + megacore) when possible."""
    target_bytes = 1 << 20
    th = max(8, min(512, (target_bytes // (padded_width * itemsize)) // 8 * 8))
    quarter = max(8, ((-(-total_rows // 4)) + 7) // 8 * 8)
    return min(th, quarter)


def sobelxy(x):
    """x: (N, 1, H, W) -> (N, 1, H, W) = |conv2d(x, Kx, pad=1)| + |conv2d(x, Ky, pad=1)|."""
    n, c, h, w = x.shape
    assert c == 1, "Sobelxy weight is (1, 1, 3, 3); input must be single-channel."

    rows = n * h
    x2 = x.reshape(rows, w)

    # Lane-dense width (multiple of 128); zero right-padding matches the
    # convolution's zero padding, the extra columns are sliced off afterwards.
    wp = max(128, (-(-w // 128)) * 128)
    itemsize = jnp.dtype(x.dtype).itemsize
    tile_rows = _pick_tile_rows(rows, wp, itemsize)
    rows_p = (-(-rows // tile_rows)) * tile_rows
    if (rows_p, wp) != (rows, w):
        x2 = jnp.pad(x2, ((0, rows_p - rows), (0, wp - w)))

    num_tiles = rows_p // tile_rows
    tile_blk8 = tile_rows // 8       # halo blocks are 8 rows tall
    num_blk8 = rows_p // 8
    tile_bytes = tile_rows * wp * itemsize

    kernel = functools.partial(
        _sobel_kernel, img_h=h, img_w=w, tile_rows=tile_rows)

    out = pl.pallas_call(
        kernel,
        out_shape=jax.ShapeDtypeStruct((rows_p, wp), x.dtype),
        grid=(num_tiles,),
        in_specs=[
            # Main row tile (auto-pipelined, double-buffered).
            pl.BlockSpec((tile_rows, wp), lambda t: (t, 0)),
            # 8-row halo blocks just above / below the tile (indices clamped at
            # the array ends; the kernel masks them at image top/bottom rows).
            pl.BlockSpec((8, wp),
                         lambda t: (jnp.maximum(t * tile_blk8 - 1, 0), 0)),
            pl.BlockSpec((8, wp),
                         lambda t: (jnp.minimum((t + 1) * tile_blk8, num_blk8 - 1), 0)),
        ],
        out_specs=pl.BlockSpec((tile_rows, wp), lambda t: (t, 0)),
        compiler_params=pltpu.CompilerParams(
            dimension_semantics=("parallel",),
            vmem_limit_bytes=int(min(48 << 20, max(32 << 20, 16 * tile_bytes))),
        ),
    )(x2, x2, x2)

    if (rows_p, wp) != (rows, w):
        out = out[:rows, :w]
    return out.reshape(n, c, h, w)


# ----------------------------------------------------------------------------
# Pure-JAX reference (F.conv2d with the fixed Sobel weights, padding=1).
# ----------------------------------------------------------------------------
_KX = ((-1.0, 0.0, 1.0), (-2.0, 0.0, 2.0), (-1.0, 0.0, 1.0))
_KY = ((1.0, 2.0, 1.0), (0.0, 0.0, 0.0), (-1.0, -2.0, -1.0))


def _reference(x):
    wx = jnp.asarray(_KX, jnp.float32).reshape(1, 1, 3, 3)
    wy = jnp.asarray(_KY, jnp.float32).reshape(1, 1, 3, 3)
    dn = lax.conv_dimension_numbers(x.shape, wx.shape, ("NCHW", "OIHW", "NCHW"))
    sx = lax.conv_general_dilated(x, wx, (1, 1), ((1, 1), (1, 1)),
                                  dimension_numbers=dn)
    sy = lax.conv_general_dilated(x, wy, (1, 1), ((1, 1), (1, 1)),
                                  dimension_numbers=dn)
    return jnp.abs(sx) + jnp.abs(sy)


if __name__ == "__main__":
    key = jax.random.PRNGKey(0)

    # Primary test shape.
    x = jax.random.normal(key, (2, 1, 16, 16), dtype=jnp.float32)
    out = jax.block_until_ready(sobelxy(x))
    ref = jax.block_until_ready(_reference(x))
    assert out.shape == x.shape and out.dtype == x.dtype
    assert jnp.allclose(out, ref, atol=1e-5, rtol=1e-5)

    # Odd sizes: W not a multiple of 128, row tiles crossing image boundaries.
    x2 = jax.random.normal(jax.random.PRNGKey(1), (2, 1, 12, 12), dtype=jnp.float32)
    out2 = jax.block_until_ready(sobelxy(x2))
    ref2 = jax.block_until_ready(_reference(x2))
    assert out2.shape == x2.shape and jnp.allclose(out2, ref2, atol=1e-5, rtol=1e-5)

    print("KERNEL_OK")
</pallas_src>

<mosaic_0001>
module attributes {stable_mosaic.version = 11 : i64} {
  func.func @_sobel_kernel(%arg0: i32, %arg1: memref<8x128xf32, #tpu.memory_space<vmem>>, %arg2: memref<8x128xf32, #tpu.memory_space<vmem>>, %arg3: memref<8x128xf32, #tpu.memory_space<vmem>>, %arg4: memref<8x128xf32, #tpu.memory_space<vmem>>) attributes {dimension_semantics = [#tpu.dimension_semantics<parallel>], iteration_bounds = array<i64: 4>, scalar_prefetch = 0 : i64, scratch_operands = 0 : i64, tpu.core_type = #tpu.core_type<tc>, window_params = [{transform_indices = @transform_0, window_bounds = array<i64: 8, 128>}, {transform_indices = @transform_1, window_bounds = array<i64: 8, 128>}, {transform_indices = @transform_2, window_bounds = array<i64: 8, 128>}, {transform_indices = @transform_3, window_bounds = array<i64: 8, 128>}]} {
    %c0 = arith.constant 0 : index
    %c0_0 = arith.constant 0 : index
    %0 = vector.load %arg1[%c0, %c0_0] : memref<8x128xf32, #tpu.memory_space<vmem>>, vector<8x128xf32>
    %1 = tpu.iota {dimensions = array<i32: 0>} : vector<8x1xi32>
    %c8_i32 = arith.constant 8 : i32
    %2 = arith.muli %arg0, %c8_i32 : i32
    %3 = vector.broadcast %2 : i32 to vector<8x1xi32>
    %4 = arith.addi %3, %1 : vector<8x1xi32>
    %c16_i32 = arith.constant 16 : i32
    %c0_i32 = arith.constant 0 : i32
    %5 = arith.cmpi eq, %c16_i32, %c0_i32 : i32
    %c1_i32 = arith.constant 1 : i32
    %6 = arith.select %5, %c1_i32, %c16_i32 : i32
    %7 = vector.broadcast %6 : i32 to vector<8x1xi32>
    %8 = arith.remsi %4, %7 : vector<8x1xi32>
    %c0_i32_1 = arith.constant 0 : i32
    %9 = vector.broadcast %c0_i32_1 : i32 to vector<8x1xi32>
    %10 = arith.cmpi ne, %8, %9 : vector<8x1xi32>
    %c0_i32_2 = arith.constant 0 : i32
    %11 = vector.broadcast %c0_i32_2 : i32 to vector<8x1xi32>
    %12 = arith.cmpi slt, %8, %11 : vector<8x1xi32>
    %c0_i32_3 = arith.constant 0 : i32
    %13 = arith.cmpi slt, %6, %c0_i32_3 : i32
    %14 = vector.broadcast %13 : i1 to vector<8x1xi1>
    %15 = vector.broadcast %14 : vector<8x1xi1> to vector<8x1xi1>
    %16 = arith.xori %12, %15 : vector<8x1xi1>
    %17 = arith.andi %16, %10 : vector<8x1xi1>
    %18 = vector.broadcast %6 : i32 to vector<8x1xi32>
    %19 = arith.addi %8, %18 : vector<8x1xi32>
    %20 = arith.select %17, %19, %8 : vector<8x1xi1>, vector<8x1xi32>
    %c0_i32_4 = arith.constant 0 : i32
    %21 = vector.broadcast %c0_i32_4 : i32 to vector<8x1xi32>
    %22 = arith.cmpi eq, %20, %21 : vector<8x1xi32>
    %c15_i32 = arith.constant 15 : i32
    %23 = vector.broadcast %c15_i32 : i32 to vector<8x1xi32>
    %24 = arith.cmpi eq, %20, %23 : vector<8x1xi32>
    %c7 = arith.constant 7 : index
    %c0_5 = arith.constant 0 : index
    %25 = vector.load %arg2[%c7, %c0_5] : memref<8x128xf32, #tpu.memory_space<vmem>>, vector<1x128xf32>
    %c0_6 = arith.constant 0 : index
    %c0_7 = arith.constant 0 : index
    %26 = vector.load %arg3[%c0_6, %c0_7] : memref<8x128xf32, #tpu.memory_space<vmem>>, vector<1x128xf32>
    %27 = vector.extract_strided_slice %0 {offsets = [7, 0], sizes = [1, 128], strides = [1, 1]} : vector<8x128xf32> to vector<1x128xf32>
    %28 = vector.extract_strided_slice %0 {offsets = [0, 0], sizes = [7, 128], strides = [1, 1]} : vector<8x128xf32> to vector<7x128xf32>
    %29 = tpu.concatenate %27, %28 in 0 : vector<1x128xf32>, vector<7x128xf32> -> vector<8x128xf32>
    %c0_i32_8 = arith.constant 0 : i32
    %30 = vector.broadcast %c0_i32_8 : i32 to vector<8x1xi32>
    %31 = arith.cmpi eq, %1, %30 : vector<8x1xi32>
    %32 = vector.shape_cast %31 : vector<8x1xi1> to vector<8x1xi1>
    %33 = vector.broadcast %32 : vector<8x1xi1> to vector<8x128xi1>
    %34 = vector.shape_cast %25 : vector<1x128xf32> to vector<1x128xf32>
    %35 = vector.broadcast %34 : vector<1x128xf32> to vector<8x128xf32>
    %36 = arith.select %33, %35, %29 : vector<8x128xi1>, vector<8x128xf32>
    %cst = arith.constant 0.000000e+00 : f32
    %37 = vector.shape_cast %22 : vector<8x1xi1> to vector<8x1xi1>
    %38 = vector.broadcast %37 : vector<8x1xi1> to vector<8x128xi1>
    %39 = vector.broadcast %cst : f32 to vector<8x128xf32>
    %40 = arith.select %38, %39, %36 : vector<8x128xi1>, vector<8x128xf32>
    %41 = vector.extract_strided_slice %0 {offsets = [1, 0], sizes = [7, 128], strides = [1, 1]} : vector<8x128xf32> to vector<7x128xf32>
    %42 = vector.extract_strided_slice %0 {offsets = [0, 0], sizes = [1, 128], strides = [1, 1]} : vector<8x128xf32> to vector<1x128xf32>
    %43 = tpu.concatenate %41, %42 in 0 : vector<7x128xf32>, vector<1x128xf32> -> vector<8x128xf32>
    %c7_i32 = arith.constant 7 : i32
    %44 = vector.broadcast %c7_i32 : i32 to vector<8x1xi32>
    %45 = arith.cmpi eq, %1, %44 : vector<8x1xi32>
    %46 = vector.shape_cast %45 : vector<8x1xi1> to vector<8x1xi1>
    %47 = vector.broadcast %46 : vector<8x1xi1> to vector<8x128xi1>
    %48 = vector.shape_cast %26 : vector<1x128xf32> to vector<1x128xf32>
    %49 = vector.broadcast %48 : vector<1x128xf32> to vector<8x128xf32>
    %50 = arith.select %47, %49, %43 : vector<8x128xi1>, vector<8x128xf32>
    %cst_9 = arith.constant 0.000000e+00 : f32
    %51 = vector.shape_cast %24 : vector<8x1xi1> to vector<8x1xi1>
    %52 = vector.broadcast %51 : vector<8x1xi1> to vector<8x128xi1>
    %53 = vector.broadcast %cst_9 : f32 to vector<8x128xf32>
    %54 = arith.select %52, %53, %50 : vector<8x128xi1>, vector<8x128xf32>
    %cst_10 = arith.constant 2.000000e+00 : f32
    %55 = vector.broadcast %cst_10 : f32 to vector<8x128xf32>
    %56 = arith.mulf %55, %0 : vector<8x128xf32>
    %57 = arith.addf %40, %56 : vector<8x128xf32>
    %58 = arith.addf %57, %54 : vector<8x128xf32>
    %59 = arith.subf %40, %54 : vector<8x128xf32>
    %60 = tpu.iota {dimensions = array<i32: 1>} : vector<1x128xi32>
    %c0_i32_11 = arith.constant 0 : i32
    %61 = vector.broadcast %c0_i32_11 : i32 to vector<1x128xi32>
    %62 = arith.cmpi ne, %60, %61 : vector<1x128xi32>
    %c15_i32_12 = arith.constant 15 : i32
    %63 = vector.broadcast %c15_i32_12 : i32 to vector<1x128xi32>
    %64 = arith.cmpi ne, %60, %63 : vector<1x128xi32>
    %65 = vector.extract_strided_slice %58 {offsets = [0, 127], sizes = [8, 1], strides = [1, 1]} : vector<8x128xf32> to vector<8x1xf32>
    %66 = vector.extract_strided_slice %58 {offsets = [0, 0], sizes = [8, 127], strides = [1, 1]} : vector<8x128xf32> to vector<8x127xf32>
    %67 = tpu.concatenate %65, %66 in 1 : vector<8x1xf32>, vector<8x127xf32> -> vector<8x128xf32>
    %cst_13 = arith.constant 0.000000e+00 : f32
    %68 = vector.shape_cast %62 : vector<1x128xi1> to vector<1x128xi1>
    %69 = vector.broadcast %68 : vector<1x128xi1> to vector<8x128xi1>
    %70 = vector.broadcast %cst_13 : f32 to vector<8x128xf32>
    %71 = arith.select %69, %67, %70 : vector<8x128xi1>, vector<8x128xf32>
    %72 = vector.extract_strided_slice %58 {offsets = [0, 1], sizes = [8, 127], strides = [1, 1]} : vector<8x128xf32> to vector<8x127xf32>
    %73 = vector.extract_strided_slice %58 {offsets = [0, 0], sizes = [8, 1], strides = [1, 1]} : vector<8x128xf32> to vector<8x1xf32>
    %74 = tpu.concatenate %72, %73 in 1 : vector<8x127xf32>, vector<8x1xf32> -> vector<8x128xf32>
    %cst_14 = arith.constant 0.000000e+00 : f32
    %75 = vector.shape_cast %64 : vector<1x128xi1> to vector<1x128xi1>
    %76 = vector.broadcast %75 : vector<1x128xi1> to vector<8x128xi1>
    %77 = vector.broadcast %cst_14 : f32 to vector<8x128xf32>
    %78 = arith.select %76, %74, %77 : vector<8x128xi1>, vector<8x128xf32>
    %79 = vector.extract_strided_slice %59 {offsets = [0, 127], sizes = [8, 1], strides = [1, 1]} : vector<8x128xf32> to vector<8x1xf32>
    %80 = vector.extract_strided_slice %59 {offsets = [0, 0], sizes = [8, 127], strides = [1, 1]} : vector<8x128xf32> to vector<8x127xf32>
    %81 = tpu.concatenate %79, %80 in 1 : vector<8x1xf32>, vector<8x127xf32> -> vector<8x128xf32>
    %cst_15 = arith.constant 0.000000e+00 : f32
    %82 = vector.shape_cast %62 : vector<1x128xi1> to vector<1x128xi1>
    %83 = vector.broadcast %82 : vector<1x128xi1> to vector<8x128xi1>
    %84 = vector.broadcast %cst_15 : f32 to vector<8x128xf32>
    %85 = arith.select %83, %81, %84 : vector<8x128xi1>, vector<8x128xf32>
    %86 = vector.extract_strided_slice %59 {offsets = [0, 1], sizes = [8, 127], strides = [1, 1]} : vector<8x128xf32> to vector<8x127xf32>
    %87 = vector.extract_strided_slice %59 {offsets = [0, 0], sizes = [8, 1], strides = [1, 1]} : vector<8x128xf32> to vector<8x1xf32>
    %88 = tpu.concatenate %86, %87 in 1 : vector<8x127xf32>, vector<8x1xf32> -> vector<8x128xf32>
    %cst_16 = arith.constant 0.000000e+00 : f32
    %89 = vector.shape_cast %64 : vector<1x128xi1> to vector<1x128xi1>
    %90 = vector.broadcast %89 : vector<1x128xi1> to vector<8x128xi1>
    %91 = vector.broadcast %cst_16 : f32 to vector<8x128xf32>
    %92 = arith.select %90, %88, %91 : vector<8x128xi1>, vector<8x128xf32>
    %93 = arith.subf %78, %71 : vector<8x128xf32>
    %cst_17 = arith.constant 2.000000e+00 : f32
    %94 = vector.broadcast %cst_17 : f32 to vector<8x128xf32>
    %95 = arith.mulf %94, %59 : vector<8x128xf32>
    %96 = arith.addf %85, %95 : vector<8x128xf32>
    %97 = arith.addf %96, %92 : vector<8x128xf32>
    %98 = math.absf %93 : vector<8x128xf32>
    %99 = math.absf %97 : vector<8x128xf32>
    %100 = arith.addf %98, %99 : vector<8x128xf32>
    %c0_18 = arith.constant 0 : index
    %c0_19 = arith.constant 0 : index
    %101 = vector.load %arg4[%c0_18, %c0_19] : memref<8x128xf32, #tpu.memory_space<vmem>>, vector<8x128xf32>
    tpu.vector_store %arg4[%c0_18, %c0_19], %100 {strides = array<i32>} : memref<8x128xf32, #tpu.memory_space<vmem>>, vector<8x128xf32>,
    return
  }
  func.func @transform_0(%arg0: i32) -> (i32, i32) {
    %c0_i32 = arith.constant 0 : i32
    %c0_i32_0 = arith.constant 0 : i32
    return %arg0, %c0_i32 : i32, i32
  }
  func.func @transform_1(%arg0: i32) -> (i32, i32) {
    %c1_i32 = arith.constant 1 : i32
    %0 = arith.muli %arg0, %c1_i32 : i32
    %c1_i32_0 = arith.constant 1 : i32
    %1 = arith.subi %0, %c1_i32_0 : i32
    %c0_i32 = arith.constant 0 : i32
    %2 = arith.maxsi %1, %c0_i32 : i32
    %c0_i32_1 = arith.constant 0 : i32
    %c0_i32_2 = arith.constant 0 : i32
    return %2, %c0_i32_1 : i32, i32
  }
  func.func @transform_2(%arg0: i32) -> (i32, i32) {
    %c1_i32 = arith.constant 1 : i32
    %0 = arith.addi %arg0, %c1_i32 : i32
    %c1_i32_0 = arith.constant 1 : i32
    %1 = arith.muli %0, %c1_i32_0 : i32
    %c3_i32 = arith.constant 3 : i32
    %2 = arith.minsi %1, %c3_i32 : i32
    %c0_i32 = arith.constant 0 : i32
    %c0_i32_1 = arith.constant 0 : i32
    return %2, %c0_i32 : i32, i32
  }
  func.func @transform_3(%arg0: i32) -> (i32, i32) {
    %c0_i32 = arith.constant 0 : i32
    %c0_i32_0 = arith.constant 0 : i32
    return %arg0, %c0_i32 : i32, i32
  }
}

</mosaic_0001>

<bundles_post_ra>
// kernel: tpu_custom_call.1
= control target key start
LH: loop header
LB: loop body
LE: loop exit
PB: predicated region body
PF: predicated region fallthrough
CT: control target
= control target key end

     0   :  { %s1219_s0 = inlined_call_operand.hbm [shape: f32[32,128], index: 0, kind: input, shape index: {}]   ;;  %s1220_s1 = inlined_call_operand.hbm [shape: f32[32,128], index: 1, kind: input, shape index: {}]   ;;  %s1221_s2 = inlined_call_operand.hbm [shape: f32[32,128], index: 2, kind: input, shape index: {}]   ;;  %s1222_s3 = inlined_call_operand.hbm [shape: f32[32,128], index: 3, kind: output, shape index: {}]  }
   0x1   :  { %1231 = sst [smem:[#allocation15_spill]] %s1219_s0 }
   0x2   :  { %1232 = sst [smem:[#allocation16_spill]] %s1220_s1 }
   0x3   :  { %8 = vsyncpa [#allocation3], 0 }
   0x4   :  { %10 = vsyncpa [#allocation3 + $0x1], 0 }
   0x5   :  { %11 = vsyncpa [#allocation6], 0 }
   0x6   :  { %13 = vsyncpa [#allocation6 + $0x1], 0 }
   0x7   :  { %14 = vsyncpa [#allocation4], 0 }
   0x8   :  { %16 = vsyncpa [#allocation4 + $0x1], 0  ;;  %s870_s12 = smov 0   ;;  %s872_s13 = smov 0  }
   0x9   :  { %s874_s14 = smov 0   ;;  %s876_s15 = smov 0  }
   0xa   :  { %s878_s16 = smov 0   ;;  %s880_s17 = smov 0  }
   0xb   :  { %s882_s18 = smov 0   ;;  %s884_s19 = smov 0  }
   0xc   :  { %s886_s20 = smov 0   ;;  %s888_s21 = smov 0  }
   0xd LB: > { %1233 = sst [smem:[#allocation13_spill]] %s838_s20  ;;  %s919_s22 = sadd.s32 4294967295, %s842_s21   ;;  %s842_s21 = sphi %s888_s21, %s1270_s21   ;;  %s838_s20 = sphi %s886_s20, %s1261_s20   ;;  %s834_s19 = sphi %s884_s19, %s1269_s19   ;;  %s830_s18 = sphi %s882_s18, %s1268_s18   ;;  %s826_s17 = sphi %s880_s17, %s1267_s17   ;;  %s822_s16 = sphi %s878_s16, %s1266_s16   ;;  %s818_s15 = sphi %s876_s15, %s1265_s15   ;;  %s814_s14 = sphi %s874_s14, %s1264_s14   ;;  %s810_s13 = sphi %s872_s13, %s1263_s13   ;;  %s806_s12 = sphi %s870_s12, %s1262_s12  }
   0xe   : > { %s922_s23 = sadd.s32 1, %s842_s21   ;;  %p1225_p0 = scmp.eq.s32.totalorder %s842_s21, 0 }
   0xf   : > { %p1224_p1 = scmp.eq.s32.totalorder %s919_s22, 0  ;;  %p53_p2 = scmp.gt.s32.totalorder %s919_s22, 0 }
  0x10   : > { %s501_s24 = sadd.s32 4294967295, %s922_s23  ;;  %s61_s25 = sadd.s32 1, %s826_s17 }
  0x11   : > { %p56_p3 = scmp.gt.s32.totalorder %s501_s24, 0  ;;  %p68_p4 = scmp.ne.s32.totalorder %s826_s17, %s822_s16 }
  0x12   : > { %s54_s26 = scalar_select %p53_p2, %s919_s22, 0 }
  0x13   : > { %s1272_s24 = smov (!%p56_p3, %s501_s24), 0  ;;  %p74_p5 = scmp.ne.s32.totalorder %s822_s16, %s818_s15 }
  0x14   : > { %s58_s27 = ssub.s32 %s54_s26, %s1272_s24  ;;  %p70_p8 = por %p68_p4, %p1225_p0 }
  0x15   : > { %p59_p7 = scmp.eq.s32.totalorder %s58_s27, 0  ;;  %p938_p9 = por %p74_p5, %p1224_p1 }
  0x16   : > { %p1223_p10 = scmp.lt.s32.totalorder %s842_s21, 4  ;;  %s174_s30 = sand.u32 1, %s842_s21  }
  0x17   : > { %s1234_s28 = scalar_select %p938_p9, 1, 0 }
  0x18   : > { %s943_s29 = scalar_select %p59_p7, %s826_s17, %s61_s25  }
  0x19   : > { %s176_s4 = sand.u32 1, %s826_s17   ;;  %s508_s6 = sshll.u32 %s54_s26, 7 }
  0x1a   : > { %s506_s5 = sshll.u32 %s176_s4, 3  ;;  %s1235_s1 = sld [smem:[#allocation16_spill]] }
  0x1b   : > { %s178_s10 = scalar_lea.vmem [#allocation5], %s506_s5  ;;  %p955_p11 = pnand %p1223_p10, %p70_p8 }
  0x1c   : > { %s188_s11 = sshll.u32 %s178_s10, 4  ;;  %s963_s24 = scalar_lea.sflag [#allocation6], %s174_s30  ;;  %s959_s11 = int_to_ptr.vmem [resolvable:$true] %s188_s11 }
  0x1d   : > { %p632_p3 = pneg %p955_p11 }
  0x20   : > { %s951_s9 = scalar_lea.hbm %s1235_s1, %s508_s6  ;;  %s635_s4 = scalar_lea.hbm %s1235_s1, 512 }
  0x21   : > { %s630_s25 = scalar_lea.hbm %s951_s9, 128  ;;  %p636_p7 = scmp.lt.u32.totalorder %s951_s9, %s1235_s1 }
  0x22   : > { %p631_p2 = scmp.ne.s32.totalorder %s951_s9, %s630_s25  ;;  %p637_p8 = scmp.lt.u32.totalorder %s635_s4, %s630_s25 }
  0x23   : > { %p639_p6 = scmp.lt.u32.totalorder %s630_s25, %s951_s9 }
  0x24   : > { %p633_p4 = pnand %p632_p3, %p631_p2  ;;  %p638_p10 = por %p637_p8, %p636_p7 }
  0x26   : > { %p634_p5 = pneg %p633_p4  ;;  %p640_p1 = por %p639_p6, %p638_p10 }
  0x28   : > { %p641_p0 = pnand %p640_p1, %p634_p5 }
  0x2a   : > { %644 = shalt.err (!%p641_p0)
}
  0x2b   : > { %s645_s30 = scalar_lea.vmem %s959_s11, 128  ;;  %s844_s7 = smov [#allocation5]  }
  0x2c   : > { %p646_p2 = scmp.ne.s32.totalorder %s959_s11, %s645_s30  ;;  %s650_s8 = sshll.u32 %s844_s7, 4  ;;  %s651_s8 = int_to_ptr.vmem [resolvable:$false] %s650_s8 }
  0x2d   : > { %s652_s10 = scalar_lea.vmem %s651_s8, 256  ;;  %p653_p13 = scmp.lt.s32.totalorder %s959_s11, %s651_s8 }
  0x2e   : > { %p648_p4 = pnand %p646_p2, %p632_p3  ;;  %p654_p7 = scmp.lt.s32.totalorder %s652_s10, %s645_s30 }
  0x30   : > { %p649_p12 = pneg %p648_p4  ;;  %p655_p8 = por %p654_p7, %p653_p13 }
  0x32   : > { %p656_p6 = pnand %p655_p8, %p649_p12 }
  0x34   : > { %659 = shalt.err (!%p656_p6)
}
  0x35   : > { %538 = dma.hbm_to_vmem [thread:$0]  (!%p955_p11), %s951_s9, 128, %s959_s11, %s963_s24  }
  0x36   : > { %p1237_p0 = scmp.lt.s32.totalorder %s842_s21, 5  ;;  %p1238_p1 = scmp.ge.s32.totalorder %s842_s21, 1 }
  0x37   : > { %s499_s25 = sadd.s32 4294967294, %s842_s21   ;;  %s26_s26 = ssub.s32 %s842_s21, %s922_s23 }
  0x38   : > { %p995_p10 = pnand %p1238_p1, %p1237_p0  ;;  %s29_s27 = sadd.s32 1, %s838_s20 }
  0x39   : > { %p27_p12 = scmp.eq.s32.totalorder %s26_s26, 0  ;;  %p36_p13 = scmp.ne.s32.totalorder %s838_s20, %s834_s19 }
  0x3a   : > { %p42_p3 = scmp.ne.s32.totalorder %s834_s19, %s830_s18  ;;  %p136_p5 = scmp.eq.s32.totalorder %s499_s25, 3 }
  0x3b   : > { %s1008_s4 = scalar_select %p27_p12, %s838_s20, %s29_s27  }
  0x3c   : > { %p1241_p2 = scmp.eq.s32.totalorder %s842_s21, 0  ;;  %p1242_p7 = scmp.eq.s32.totalorder %s919_s22, 0 }
  0x3d   : > { %1240 = sst [smem:[#allocation14_spill]] %s1008_s4  ;;  %p1244_p8 = scmp.eq.s32.totalorder %s919_s22, 3 }
  0x3e   : > { %p38_p4 = por %p1241_p2, %p36_p13  ;;  %p1014_p11 = por %p1242_p7, %p42_p3 }
  0x3f   : > { %p1020_p6 = por %p1244_p8, %p36_p13  ;;  %p1024_p0 = por %p136_p5, %p42_p3 }
  0x40   : > { %s1243_s9 = scalar_select %p1014_p11, 1, 0 }
  0x41   : > { %s1245_s11 = scalar_select %p1020_p6, 1, 0 }
  0x42   : > { %s1246_s5 = scalar_select %p1024_p0, 1, 0 }
  0x43   : > { %s156_s6 = sand.u32 1, %s838_s20   ;;  %s505_s30 = sshll.u32 %s842_s21, 7 }
  0x44   : > { %s504_s7 = sshll.u32 %s156_s6, 3  ;;  %s1247_s0 = sld [smem:[#allocation15_spill]] }
  0x45   : > { %s160_s26 = scalar_lea.vmem [#allocation2], %s504_s7  ;;  %p1248_p1 = scmp.lt.s32.totalorder %s842_s21, 4 }
  0x46   : > { %s167_s27 = sshll.u32 %s160_s26, 4  ;;  %s157_s4 = scalar_lea.sflag [#allocation3], %s156_s6  ;;  %s1041_s27 = int_to_ptr.vmem [resolvable:$true] %s167_s27 }
  0x47   : > { %p1037_p12 = pnand %p1248_p1, %p38_p4 }
  0x49   : > { %p662_p3 = pneg %p1037_p12 }
  0x4a   : > { %s1033_s25 = scalar_lea.hbm %s1247_s0, %s505_s30  ;;  %s665_s8 = scalar_lea.hbm %s1247_s0, 512 }
  0x4b   : > { %s660_s20 = scalar_lea.hbm %s1033_s25, 128  ;;  %p666_p4 = scmp.lt.u32.totalorder %s1033_s25, %s1247_s0 }
  0x4c   : > { %p661_p13 = scmp.ne.s32.totalorder %s1033_s25, %s660_s20  ;;  %p667_p7 = scmp.lt.u32.totalorder %s665_s8, %s660_s20 }
  0x4d   : > { %p669_p1 = scmp.lt.u32.totalorder %s660_s20, %s1033_s25 }
  0x4e   : > { %p663_p5 = pnand %p662_p3, %p661_p13  ;;  %p668_p8 = por %p667_p7, %p666_p4 }
  0x50   : > { %p664_p2 = pneg %p663_p5  ;;  %p670_p0 = por %p669_p1, %p668_p8 }
  0x52   : > { %p671_p6 = pnand %p670_p0, %p664_p2 }
  0x54   : > { %674 = shalt.err (!%p671_p6)
}
  0x55   : > { %s675_s6 = scalar_lea.vmem %s1041_s27, 128  ;;  %s845_s30 = smov [#allocation2]  }
  0x56   : > { %p676_p13 = scmp.ne.s32.totalorder %s1041_s27, %s675_s6  ;;  %s680_s7 = sshll.u32 %s845_s30, 4  ;;  %s681_s7 = int_to_ptr.vmem [resolvable:$false] %s680_s7 }
  0x57   : > { %s682_s10 = scalar_lea.vmem %s681_s7, 256  ;;  %p683_p11 = scmp.lt.s32.totalorder %s1041_s27, %s681_s7 }
  0x58   : > { %p678_p5 = pnand %p676_p13, %p662_p3  ;;  %p684_p4 = scmp.lt.s32.totalorder %s682_s10, %s675_s6 }
  0x5a   : > { %p679_p9 = pneg %p678_p5  ;;  %p685_p7 = por %p684_p4, %p683_p11 }
  0x5c   : > { %p686_p8 = pnand %p685_p7, %p679_p9 }
  0x5e   : > { %689 = shalt.err (!%p686_p8)
}
  0x5f   : > { %535 = dma.hbm_to_vmem [thread:$0]  (!%p1037_p12), %s1033_s25, 128, %s1041_s27, %s157_s4  }
  0x60   : > { %p85_p11 = scmp.lt.s32.totalorder %s922_s23, 3  ;;  %s87_s20 = sadd.s32 1, %s922_s23 }
  0x61   : > { %p88_p9 = scmp.lt.s32.totalorder %s87_s20, 3  ;;  %s93_s8 = sadd.s32 1, %s814_s14 }
  0x62   : > { %s86_s1 = scalar_select %p85_p11, %s922_s23, 3 }
  0x63   : > { %s1274_s20 = smov (!%p88_p9, %s87_s20), 3  ;;  %p100_p6 = scmp.ne.s32.totalorder %s814_s14, %s810_s13 }
  0x64   : > { %p106_p0 = scmp.ne.s32.totalorder %s810_s13, %s806_s12  ;;  %s90_s26 = ssub.s32 %s86_s1, %s1274_s20 }
  0x65   : > { %s197_s6 = sand.u32 1, %s814_s14   ;;  %p91_p3 = scmp.eq.s32.totalorder %s90_s26, 0 }
  0x66   : > { %p1250_p2 = scmp.eq.s32.totalorder %s842_s21, 0  ;;  %p1251_p13 = scmp.eq.s32.totalorder %s919_s22, 0 }
  0x67   : > { %s509_s4 = sshll.u32 %s197_s6, 3  ;;  %s510_s27 = sshll.u32 %s86_s1, 7 }
  0x68   : > { %p102_p1 = por %p100_p6, %p1250_p2  ;;  %p1081_p5 = por %p106_p0, %p1251_p13 }
  0x69   : > { %s1086_s25 = scalar_select %p91_p3, %s814_s14, %s93_s8  }
  0x6a   : > { %s1252_s30 = scalar_select %p1081_p5, 1, 0 }
  0x6b   : > { %s1091_s0 = scalar_lea.hbm %s1221_s2, %s510_s27  ;;  %s199_s12 = scalar_lea.vmem [#allocation7], %s509_s4 }
  0x6c   : > { %s209_s20 = sshll.u32 %s199_s12, 4  ;;  %p1253_p12 = scmp.lt.s32.totalorder %s842_s21, 4  ;;  %s1093_s20 = int_to_ptr.vmem [resolvable:$true] %s209_s20 }
  0x6d   : > { %s690_s8 = scalar_lea.hbm %s1091_s0, 128  ;;  %s695_s4 = scalar_lea.hbm %s1221_s2, 512 }
  0x6e   : > { %p1097_p4 = pnand %p1253_p12, %p102_p1  ;;  %p691_p7 = scmp.ne.s32.totalorder %s1091_s0, %s690_s8 }
  0x6f   : > { %p696_p6 = scmp.lt.u32.totalorder %s1091_s0, %s1221_s2  ;;  %p697_p0 = scmp.lt.u32.totalorder %s695_s4, %s690_s8 }
  0x70   : > { %p692_p8 = pneg %p1097_p4  ;;  %p699_p2 = scmp.lt.u32.totalorder %s690_s8, %s1091_s0 }
  0x71   : > { %p698_p3 = por %p697_p0, %p696_p6 }
  0x72   : > { %p693_p11 = pnand %p692_p8, %p691_p7 }
  0x73   : > { %p700_p1 = por %p699_p2, %p698_p3 }
  0x74   : > { %p694_p9 = pneg %p693_p11 }
  0x76   : > { %p701_p13 = pnand %p700_p1, %p694_p9 }
  0x78   : > { %704 = shalt.err (!%p701_p13)
}
  0x79   : > { %s705_s10 = scalar_lea.vmem %s1093_s20, 128  ;;  %s846_s12 = smov [#allocation7]  }
  0x7a   : > { %p706_p12 = scmp.ne.s32.totalorder %s1093_s20, %s705_s10  ;;  %s710_s1 = sshll.u32 %s846_s12, 4  ;;  %s711_s1 = int_to_ptr.vmem [resolvable:$false] %s710_s1 }
  0x7b   : > { %s712_s6 = scalar_lea.vmem %s711_s1, 256  ;;  %p713_p5 = scmp.lt.s32.totalorder %s1093_s20, %s711_s1 }
  0x7c   : > { %p708_p7 = pnand %p706_p12, %p692_p8  ;;  %p714_p6 = scmp.lt.s32.totalorder %s712_s6, %s705_s10 }
  0x7e   : > { %p709_p11 = pneg %p708_p7  ;;  %p715_p0 = por %p714_p6, %p713_p5 }
  0x80   : > { %p716_p3 = pnand %p715_p0, %p709_p11 }
  0x82   : > { %719 = shalt.err (!%p716_p3)
}
  0x83   : > { %541 = dma.hbm_to_vmem [thread:$0]  (!%p1097_p4), %s1091_s0, 128, %s1093_s20, %s963_s24  }
  0x84   : > { %218 = sbr.rel (%p995_p10) target bundleno = 313 (0x139), region = 32  ;;  %s1130_s8 = sand.u32 (!%p995_p10), 1, %s834_s19  }
  0x85   : > { %s512_s4 = sshll.u32 (!%p995_p10), %s1130_s8, 3  ;;  %s221_s27 = scalar_lea.sflag (!%p995_p10), [#allocation3], %s1130_s8 }
  0x86   : > { %s224_s7 = scalar_lea.vmem (!%p995_p10), [#allocation2], %s512_s4  ;;  %p1255_p5 = scmp.ne.s32.totalorder (!%p995_p10), %s1243_s9, 0 }
  0x8b   : > { %789 = dma.done.wait (%p1255_p5), %s221_s27, 128  }
  0x8c   : > { %791 = vsyncadd (%p1255_p5), %s221_s27, 4294967168  ;;  %s229_s0 = sand.u32 1, %s919_s22   ;;  %s231_s24 = sand.u32 1, %s822_s16  }
  0x8d   : > { %s513_s15 = sshll.u32 %s231_s24, 3  ;;  %s230_s20 = scalar_lea.sflag [#allocation6], %s229_s0 }
  0x8e   : > { %s233_s26 = scalar_lea.vmem [#allocation5], %s513_s15  ;;  %p1256_p10 = scmp.ne.s32.totalorder %s1234_s28, 0 }
  0x90   : > { %793 = dma.done.wait (%p1256_p10), %s230_s20, 128  }
  0x91   : > { %795 = vsyncadd (%p1256_p10), %s230_s20, 4294967168  ;;  %s240_s10 = sand.u32 1, %s810_s13   ;;  %p1257_p4 = scmp.ne.s32.totalorder %s1252_s30, 0 }
  0x92   : > { %s514_s12 = sshll.u32 %s240_s10, 3 }
  0x93   : > { %s242_s1 = scalar_lea.vmem [#allocation7], %s514_s12 }
  0x94   : > { %797 = dma.done.wait (%p1257_p4), %s230_s20, 128  }
  0x95   : > { %799 = vsyncadd (%p1257_p4), %s230_s20, 4294967168  ;;  %v282_v0 = vlaneseq  ;;  %s516_s9 = sshll.u32 %s919_s22, 3  ;;  %v281_v6 = vld [vmem:[%s224_s7] sm:$0xff]  ;;  %v518_v11 = vld [vmem:[%s233_s26 + $0x7] ss:$0 sm:$0xff]  ;;  %s847_s28 = smov 1  }
  0x96   : > { %v285_v1 = vstv %s516_s9  ;;  %v304_v9 = vrot.slane %v281_v6, 7  ;;  %v319_v10 = vrot.slane %v281_v6, 1  ;;  %v519_v12 = vld [vmem:[%s242_s1] ss:$0 sm:$0xff]  ;;  %v334_v17 = vmul.f32 2.0, %v281_v6  ;;  %s848_s30 = smov 127  }
  0x97   : > { %v283_v2 = vshrl.u32 %v282_v0, 7  ;;  %v339_v24 = vand.u32 127, %v282_v0  ;;  %s521_s6 = sshll.u32 %s919_s22, 7  ;;  %s274_s27 = scalar_lea.vmem [#allocation8], %s512_s4 }
  0x98   : > { %s386_s7 = sshll.u32 %s274_s27, 4  ;;  %s1158_s15 = scalar_lea.hbm %s1222_s3, %s521_s6  ;;  %s1160_s7 = int_to_ptr.vmem [resolvable:$true] %s386_s7 }
  0x99   : > { %v286_v3 = vadd.s32 %v285_v1, %v283_v2  ;;  %vm308_vm1 = vcmp.eq.s32.totalorder %v283_v2, 0  ;;  %vm323_vm2 = vcmp.eq.s32.totalorder %v283_v2, 7  ;;  %vm340_vm8 = vcmp.ne.s32.totalorder %v339_v24, 0  ;;  %s373_s20 = scalar_lea.sflag [#allocation4], %s1130_s8  ;;  %s720_s26 = scalar_lea.vmem %s1160_s7, 128 }
  0x9a   : > { %v315_v15 = vsel %vm308_vm1, %v518_v11, %v304_v9  ;;  %v330_v16 = vsel %vm323_vm2, %v519_v12, %v319_v10  ;;  %vm341_vm9 = vcmp.ne.s32.totalorder %v339_v24, 15  ;;  %p721_p8 = scmp.ne.s32.totalorder %s1160_s7, %s720_s26  ;;  %p1258_p9 = scmp.ne.s32.totalorder %s1245_s11, 0 }
  0x9b   : > { %v288_v4 = vsub.s32 0, %v286_v3  ;;  %vm287_vm0 = vcmp.lt.s32.totalorder %v286_v3, 0  ;;  %s849_s22 = smov [#allocation8]  }
  0x9c   : > { %p722_p2 = pnand %p721_p8, %p1258_p9  ;;  %s724_s4 = sshll.u32 %s849_s22, 4  ;;  %s725_s4 = int_to_ptr.vmem [resolvable:$false] %s724_s4 }
  0x9d   : > { %v517_v5 = vmin.u32 %v288_v4, %v286_v3  ;;  %s726_s10 = scalar_lea.vmem %s725_s4, 256  ;;  %p727_p13 = scmp.lt.s32.totalorder %s1160_s7, %s725_s4 }
  0x9e   : > { %p723_p1 = pneg %p722_p2  ;;  %p728_p12 = scmp.lt.s32.totalorder %s726_s10, %s720_s26 }
  0x9f   : > { %v291_v7 = vand.u32 15, %v517_v5 }
  0xa0   : > { %p729_p7 = por %p728_p12, %p727_p13 }
  0xa1   : > { %v292_v8 = vsub.s32 0, %v291_v7 }
  0xa2   : > { %p730_p11 = pnand %p729_p7, %p723_p1 }
  0xa3   : > { %v293_v13 = vsel %vm287_vm0, %v292_v8, %v291_v7 }
  0xa4   : > { %vm294_vm3 = vcmp.ne.s32.totalorder %v293_v13, 0  ;;  %vm295_vm4 = vcmp.lt.s32.totalorder %v293_v13, 0  ;;  %v297_v14 = vadd.s32 16, %v293_v13 }
  0xa5   : > { %vm296_vm5 = vmand %vm295_vm4, %vm294_vm3 }
  0xa6   : > { %v298_v18 = vsel %vm296_vm5, %v297_v14, %v293_v13 }
  0xa7   : > { %vm299_vm6 = vcmp.eq.s32.totalorder %v298_v18, 0  ;;  %vm300_vm7 = vcmp.eq.s32.totalorder %v298_v18, 15 }
  0xa8   : > { %v318_v19 = vsel %vm299_vm6, 0.0, %v315_v15  ;;  %v333_v20 = vsel %vm300_vm7, 0.0, %v330_v16 }
  0xa9   : > { %v337_v21 = vsub.f32 %v318_v19, %v333_v20  ;;  %v335_v22 = vadd.f32 %v334_v17, %v318_v19 }
  0xab   : > { %356 = vrot.lane.b32.xlu0 %v337_v21, %s847_s28  ;;  %v336_v23 = vadd.f32 %v335_v22, %v333_v20  ;;  %v365_v25 = vmul.f32 2.0, %v337_v21 }
  0xad   : > { %349 = vrot.lane.b32.xlu1 %v336_v23, %s848_s30 }
  0xaf   : > { %343 = vrot.lane.b32.xlu0 %v336_v23, %s847_s28 }
  0xb1   : > { %360 = vrot.lane.b32.xlu1 %v337_v21, %s848_s30 }
 0x11d   : > { %v357_v26 = vpop.permute.xlu0 %356 }
 0x11e   : > { %v359_v27 = vsel %vm340_vm8, %v357_v26, 0.0 }
 0x11f   : > { %v366_v28 = vadd.f32 %v365_v25, %v359_v27  ;;  %v350_v29 = vpop.permute.xlu1 %349 }
 0x120   : > { %v354_v31 = vsel %vm341_vm9, %v350_v29, 0.0 }
 0x121   : > { %v344_v30 = vpop.permute.xlu0 %343 }
 0x122   : > { %v348_v32 = vsel %vm340_vm8, %v344_v30, 0.0 }
 0x123   : > { %v364_v33 = vsub.f32 %v354_v31, %v348_v32  ;;  %v361_v34 = vpop.permute.xlu1 %360 }
 0x124   : > { %v363_v35 = vsel %vm341_vm9, %v361_v34, 0.0 }
 0x125   : > { %v367_v36 = vadd.f32 %v366_v28, %v363_v35  ;;  %v368_v37 = vand.u32 2147483647, %v364_v33 }
 0x127   : > { %v369_v38 = vand.u32 2147483647, %v367_v36 }
 0x129   : > { %v370_v39 = vadd.f32 %v369_v38, %v368_v37 }
 0x12b   : > { %371 = vst [vmem:[%s274_s27] sm:$0xff] %v370_v39 }
 0x12c   : > { %733 = shalt.err (!%p730_p11)
}
 0x12d   : > { %s734_s8 = scalar_lea.hbm %s1158_s15, 128  ;;  %s738_s9 = scalar_lea.hbm %s1222_s3, 512 }
 0x12e   : > { %p735_p6 = scmp.ne.s32.totalorder %s1158_s15, %s734_s8  ;;  %p739_p5 = scmp.lt.u32.totalorder %s1158_s15, %s1222_s3 }
 0x12f   : > { %p740_p10 = scmp.lt.u32.totalorder %s738_s9, %s734_s8  ;;  %p742_p8 = scmp.lt.u32.totalorder %s734_s8, %s1158_s15 }
 0x130   : > { %p736_p0 = pnand %p735_p6, %p1258_p9 }
 0x131   : > { %p741_p4 = por %p740_p10, %p739_p5 }
 0x132   : > { %p737_p3 = pneg %p736_p0 }
 0x133   : > { %p743_p2 = por %p742_p8, %p741_p4 }
 0x135   : > { %p744_p1 = pnand %p743_p2, %p737_p3 }
 0x137   : > { %747 = shalt.err (!%p744_p1)
}
 0x138   : > { %530 = dma.vmem_to_hbm [thread:$0]  (%p1258_p9), %s1160_s7, 128, %s1158_s15, %s373_s20  }
 0x139 PF: > { %p547_p13 = scmp.ge.s32.totalorder %s842_s21, 2  ;;  %s398_s6 = sand.u32 1, %s830_s18  }
 0x13a   : > { %p1259_p12 = scmp.ne.s32.totalorder %s1246_s5, 0  ;;  %s399_s27 = scalar_lea.sflag [#allocation4], %s398_s6 }
 0x13c   : > { %p543_p7 = pnand %p547_p13, %p1259_p12 }
 0x13e   : > { %801 = dma.done.wait (!%p543_p7), %s399_s27, 128  }
 0x13f   : > { %803 = vsyncadd (!%p543_p7), %s399_s27, 4294967168  ;;  %s1260_s11 = sld [smem:[#allocation13_spill]]  ;;  %s1261_s20 = sld [smem:[#allocation14_spill]] }
 0x140   : > { %p19_p9 = scmp.ge.s32.totalorder %s922_s23, 6   ;;  %s1262_s12 = smov %s810_s13 }
 0x141   : > { %s1263_s13 = smov %s814_s14  ;;  %s1264_s14 = smov %s1086_s25 }
 0x142   : > { %s1265_s15 = smov %s822_s16  ;;  %s1266_s16 = smov %s826_s17 }
 0x143   : > { %s1267_s17 = smov %s943_s29  ;;  %s1268_s18 = smov %s834_s19 }
 0x144   : > { %s1270_s21 = smov %s922_s23  ;;  %21 = sbr.rel (!%p19_p9) target bundleno = 13 (0xd), region = 101 }
 0x145   : > { %s1269_s19 = smov %s1260_s11 }
 0x14b   :  { %404 = vsyncpa [#allocation3], 1 }
 0x14c   :  { %406 = vsyncpa [#allocation3 + $0x1], 1 }
 0x14d   :  { %407 = vsyncpa [#allocation6], 1 }
 0x14e   :  { %409 = vsyncpa [#allocation6 + $0x1], 1 }
 0x14f   :  { %410 = vsyncpa [#allocation4], 1 }
 0x150   :  { %412 = vsyncpa [#allocation4 + $0x1], 1 }

</bundles_post_ra>
